<compile_context>
chip_gen: v6e
topology: v6e:2x2x1
jax: 0.10.0
libtpu: 0.0.40
codegen_flags: <defaults>
</compile_context>

<pallas_src>
import functools
import math

import jax
import jax.numpy as jnp
from jax.experimental import pallas as pl
from jax.experimental.pallas import tpu as pltpu


def _precision_net_kernel(xT_ref, w1T_ref, b1_ref, w2T_ref, b2_ref, oT_ref,
                          *, lpmin, lpmax):
    """Fused feature-major MLP tile.

    xT_ref  : (nx, TB) VMEM  -- batch tile on the lane axis (dense vregs)
    w1T_ref : (H,  nx) VMEM  -- resident across the whole grid
    b1_ref  : (H,  1)  VMEM
    w2T_ref : (ny, H)  VMEM
    b2_ref  : (ny, 1)  VMEM
    oT_ref  : (ny, TB) VMEM  -- lane-dense stores
    """
    x = xT_ref[...]  # already f32; no redundant astype

    # Layer 1: (H, nx) @ (nx, TB) -> (H, TB), f32 accumulate; ReLU on the VPU.
    h = jnp.dot(w1T_ref[...], x, preferred_element_type=jnp.float32)
    h = jnp.maximum(h + b1_ref[...], 0.0)

    # Layer 2: (ny, H) @ (H, TB) -> (ny, TB).
    y = jnp.dot(w2T_ref[...], h, preferred_element_type=jnp.float32)
    y = y + b2_ref[...]

    # clip bounds are compile-time Python floats; exp goes to the EUP.
    oT_ref[...] = jnp.exp(jnp.clip(y, lpmin, lpmax))


def precision_net_forward(x, w1, b1, w2, b2, pmin=0.001, pmax=1000.0,
                          block_batch=512):
    """x: (B, nx) f32; w1: (nx, H); b1: (H,); w2: (H, ny); b2: (ny,).

    Returns (B, ny) f32, identical semantics to the PyTorch module.
    """
    B, nx = x.shape
    H = w1.shape[1]
    ny = w2.shape[1]

    # Batch tile: multiple of 128 so the lane axis of every x/out block is dense.
    TB = max(128, (int(block_batch) // 128) * 128)
    B_pad = ((B + TB - 1) // TB) * TB
    n_blocks = B_pad // TB

    # Feature-major layouts: batch on the fast (lane) axis; zero-pad the batch.
    xT = jnp.zeros((nx, B_pad), jnp.float32).at[:, :B].set(x.T)
    w1T = w1.T.astype(jnp.float32)          # (H, nx)
    w2T = w2.T.astype(jnp.float32)          # (ny, H)
    b1c = b1.reshape(H, 1).astype(jnp.float32)
    b2c = b2.reshape(ny, 1).astype(jnp.float32)

    lpmin = float(math.log(pmin))
    lpmax = float(math.log(pmax))

    weight_bytes = 4 * (nx * H + H + H * ny + ny)
    cost = pl.CostEstimate(
        flops=2 * B_pad * (nx * H + H * ny),
        transcendentals=B_pad * ny,
        bytes_accessed=4 * B_pad * (nx + ny) + weight_bytes,
    )

    kernel = functools.partial(_precision_net_kernel, lpmin=lpmin, lpmax=lpmax)

    outT = pl.pallas_call(
        kernel,
        out_shape=jax.ShapeDtypeStruct((ny, B_pad), jnp.float32),
        grid=(n_blocks,),
        in_specs=[
            pl.BlockSpec((nx, TB), lambda i: (0, i)),   # streamed batch tiles
            pl.BlockSpec((H, nx), lambda i: (0, 0)),    # weights stay resident
            pl.BlockSpec((H, 1), lambda i: (0, 0)),
            pl.BlockSpec((ny, H), lambda i: (0, 0)),
            pl.BlockSpec((ny, 1), lambda i: (0, 0)),
        ],
        out_specs=pl.BlockSpec((ny, TB), lambda i: (0, i)),
        compiler_params=pltpu.CompilerParams(
            dimension_semantics=("parallel",),          # 2x on v7x megacore
            vmem_limit_bytes=32 * 1024 * 1024,          # safe on v5e/v6e/v7x
        ),
        cost_estimate=cost,
    )(xT, w1T, b1c, w2T, b2c)

    # Back to (B, ny) row-major and strip the batch padding.
    return outT.T[:B]


def init_params(key, nx, ny, hidden=32):
    """Deterministic PyTorch-style init: U(-1/sqrt(fan_in), 1/sqrt(fan_in))."""
    k1, k2, k3, k4 = jax.random.split(key, 4)
    bound1 = 1.0 / math.sqrt(nx)
    bound2 = 1.0 / math.sqrt(hidden)
    w1 = jax.random.uniform(k1, (nx, hidden), jnp.float32, -bound1, bound1)
    b1 = jax.random.uniform(k2, (hidden,), jnp.float32, -bound1, bound1)
    w2 = jax.random.uniform(k3, (hidden, ny), jnp.float32, -bound2, bound2)
    b2 = jax.random.uniform(k4, (ny,), jnp.float32, -bound2, bound2)
    return w1, b1, w2, b2


def reference_forward(x, w1, b1, w2, b2, pmin=0.001, pmax=1000.0):
    """Pure-JAX reference for correctness checking."""
    h = jnp.maximum(x @ w1 + b1, 0.0)
    y = h @ w2 + b2
    return jnp.exp(jnp.clip(y, math.log(pmin), math.log(pmax)))


if __name__ == "__main__":
    key = jax.random.PRNGKey(0)
    kx, kp, kb = jax.random.split(key, 3)

    nx, ny, hidden = 4, 8, 32
    w1, b1, w2, b2 = init_params(kp, nx, ny, hidden)

    # Small shape consistent with the module's forward (batch, nx).
    batch = 2
    x = jax.random.normal(kx, (batch, nx), dtype=jnp.float32)

    out = precision_net_forward(x, w1, b1, w2, b2)
    out = jax.block_until_ready(out)
    ref = reference_forward(x, w1, b1, w2, b2)
    assert out.shape == (batch, ny)
    assert jnp.allclose(out, ref, rtol=1e-5, atol=1e-5), (out, ref)

    # Larger batch to exercise the multi-tile grid (non-multiple of the tile).
    big_batch = 1000
    xb = jax.random.normal(kb, (big_batch, nx), dtype=jnp.float32)
    out_b = jax.block_until_ready(precision_net_forward(xb, w1, b1, w2, b2))
    ref_b = reference_forward(xb, w1, b1, w2, b2)
    assert out_b.shape == (big_batch, ny)
    assert jnp.allclose(out_b, ref_b, rtol=1e-5, atol=1e-5)

    print("KERNEL_OK")
</pallas_src>

<mosaic_0001>
module attributes {stable_mosaic.version = 11 : i64} {
  func.func @_precision_net_kernel(%arg0: i32, %arg1: memref<4x512xf32, #tpu.memory_space<vmem>>, %arg2: memref<32x4xf32, #tpu.memory_space<vmem>>, %arg3: memref<32x1xf32, #tpu.memory_space<vmem>>, %arg4: memref<8x32xf32, #tpu.memory_space<vmem>>, %arg5: memref<8x1xf32, #tpu.memory_space<vmem>>, %arg6: memref<8x512xf32, #tpu.memory_space<vmem>>) attributes {dimension_semantics = [#tpu.dimension_semantics<parallel>], iteration_bounds = array<i64: 1>, scalar_prefetch = 0 : i64, scratch_operands = 0 : i64, tpu.core_type = #tpu.core_type<tc>, window_params = [{transform_indices = @transform_0, window_bounds = array<i64: 4, 512>}, {pipeline_mode = #tpu.pipeline_mode<synchronous>, transform_indices = @transform_1, window_bounds = array<i64: 32, 4>}, {pipeline_mode = #tpu.pipeline_mode<synchronous>, transform_indices = @transform_2, window_bounds = array<i64: 32, 1>}, {pipeline_mode = #tpu.pipeline_mode<synchronous>, transform_indices = @transform_3, window_bounds = array<i64: 8, 32>}, {pipeline_mode = #tpu.pipeline_mode<synchronous>, transform_indices = @transform_4, window_bounds = array<i64: 8, 1>}, {transform_indices = @transform_5, window_bounds = array<i64: 8, 512>}]} {
    %c0 = arith.constant 0 : index
    %c0_0 = arith.constant 0 : index
    %0 = vector.load %arg1[%c0, %c0_0] : memref<4x512xf32, #tpu.memory_space<vmem>>, vector<4x512xf32>
    %c0_1 = arith.constant 0 : index
    %c0_2 = arith.constant 0 : index
    %1 = vector.load %arg2[%c0_1, %c0_2] : memref<32x4xf32, #tpu.memory_space<vmem>>, vector<32x4xf32>
    %cst = arith.constant dense<0.000000e+00> : vector<32x512xf32>
    %2 = tpu.matmul %1, %0, %cst {dimension_numbers = #tpu.dot_dimension_numbers<[1], [0], [0], [1], [0, 0, 1, 1], [], []>} : vector<32x4xf32>, vector<4x512xf32>, vector<32x512xf32> -> vector<32x512xf32>
    %c0_3 = arith.constant 0 : index
    %c0_4 = arith.constant 0 : index
    %3 = vector.load %arg3[%c0_3, %c0_4] : memref<32x1xf32, #tpu.memory_space<vmem>>, vector<32x1xf32>
    %4 = vector.broadcast %3 : vector<32x1xf32> to vector<32x512xf32>
    %5 = arith.addf %2, %4 : vector<32x512xf32>
    %cst_5 = arith.constant 0.000000e+00 : f32
    %6 = vector.broadcast %cst_5 : f32 to vector<32x512xf32>
    %7 = arith.maximumf %5, %6 : vector<32x512xf32>
    %c0_6 = arith.constant 0 : index
    %c0_7 = arith.constant 0 : index
    %8 = vector.load %arg4[%c0_6, %c0_7] : memref<8x32xf32, #tpu.memory_space<vmem>>, vector<8x32xf32>
    %cst_8 = arith.constant dense<0.000000e+00> : vector<8x512xf32>
    %9 = tpu.matmul %8, %7, %cst_8 {dimension_numbers = #tpu.dot_dimension_numbers<[1], [0], [0], [1], [0, 0, 1, 1], [], []>} : vector<8x32xf32>, vector<32x512xf32>, vector<8x512xf32> -> vector<8x512xf32>
    %c0_9 = arith.constant 0 : index
    %c0_10 = arith.constant 0 : index
    %10 = vector.load %arg5[%c0_9, %c0_10] : memref<8x1xf32, #tpu.memory_space<vmem>>, vector<8x1xf32>
    %11 = vector.broadcast %10 : vector<8x1xf32> to vector<8x512xf32>
    %12 = arith.addf %9, %11 : vector<8x512xf32>
    %cst_11 = arith.constant -6.90775537 : f32
    %cst_12 = arith.constant 6.90775537 : f32
    %13 = vector.broadcast %cst_11 : f32 to vector<8x512xf32>
    %14 = arith.maximumf %13, %12 : vector<8x512xf32>
    %15 = vector.broadcast %cst_12 : f32 to vector<8x512xf32>
    %16 = arith.minimumf %15, %14 : vector<8x512xf32>
    %17 = math.exp %16 : vector<8x512xf32>
    %c0_13 = arith.constant 0 : index
    %c0_14 = arith.constant 0 : index
    %18 = vector.load %arg6[%c0_13, %c0_14] : memref<8x512xf32, #tpu.memory_space<vmem>>, vector<8x512xf32>
    tpu.vector_store %arg6[%c0_13, %c0_14], %17 {strides = array<i32>} : memref<8x512xf32, #tpu.memory_space<vmem>>, vector<8x512xf32>,
    return
  }
  func.func @transform_0(%arg0: i32) -> (i32, i32) {
    %c0_i32 = arith.constant 0 : i32
    %c0_i32_0 = arith.constant 0 : i32
    return %c0_i32, %arg0 : i32, i32
  }
  func.func @transform_1(%arg0: i32) -> (i32, i32) {
    %c0_i32 = arith.constant 0 : i32
    %c0_i32_0 = arith.constant 0 : i32
    %c0_i32_1 = arith.constant 0 : i32
    return %c0_i32, %c0_i32_0 : i32, i32
  }
  func.func @transform_2(%arg0: i32) -> (i32, i32) {
    %c0_i32 = arith.constant 0 : i32
    %c0_i32_0 = arith.constant 0 : i32
    %c0_i32_1 = arith.constant 0 : i32
    return %c0_i32, %c0_i32_0 : i32, i32
  }
  func.func @transform_3(%arg0: i32) -> (i32, i32) {
    %c0_i32 = arith.constant 0 : i32
    %c0_i32_0 = arith.constant 0 : i32
    %c0_i32_1 = arith.constant 0 : i32
    return %c0_i32, %c0_i32_0 : i32, i32
  }
  func.func @transform_4(%arg0: i32) -> (i32, i32) {
    %c0_i32 = arith.constant 0 : i32
    %c0_i32_0 = arith.constant 0 : i32
    %c0_i32_1 = arith.constant 0 : i32
    return %c0_i32, %c0_i32_0 : i32, i32
  }
  func.func @transform_5(%arg0: i32) -> (i32, i32) {
    %c0_i32 = arith.constant 0 : i32
    %c0_i32_0 = arith.constant 0 : i32
    return %c0_i32, %arg0 : i32, i32
  }
}

</mosaic_0001>

<bundles_post_ra>
// kernel: tpu_custom_call.1
= control target key start
LH: loop header
LB: loop body
LE: loop exit
PB: predicated region body
PF: predicated region fallthrough
CT: control target
= control target key end

     0   :  { %vm68_vm0 = vcmask 1043456   ;;  %v513_v4 = vmov 0.0   ;;  %vm55_vm1 = vcmask 31744   ;;  %v514_v6 = vmov 0   ;;  %s597_s0 = inlined_call_operand.vmem [shape: f32[4,512], index: 0, kind: input, shape index: {}]   ;;  %s598_s1 = inlined_call_operand.vmem [shape: f32[32,4], index: 1, kind: input, shape index: {}]   ;;  %s599_s2 = inlined_call_operand.vmem [shape: f32[32,1], index: 2, kind: input, shape index: {}]   ;;  %s600_s3 = inlined_call_operand.vmem [shape: f32[8,32], index: 3, kind: input, shape index: {}]   ;;  %s601_s4 = inlined_call_operand.vmem [shape: f32[8,1], index: 4, kind: input, shape index: {}]   ;;  %s602_s5 = inlined_call_operand.hbm [shape: f32[8,512], index: 5, kind: output, shape index: {}]  }
   0x1   :  { %v21_v0 = vld [vmem:[%s597_s0] sm:$0xff]  ;;  %v22_v1 = vld [vmem:[%s597_s0 + $0x8] sm:$0xff]  ;;  %141 = vmatprep.mubr.f32.mxu0 %v513_v4  ;;  %230 = vmatprep.mubr.f32.mxu1 %v513_v4 }
   0x2   :  { %v53_v2 = vcombine.high %v21_v0, %v21_v0  ;;  %v54_v3 = vcombine.high %v22_v1, %v22_v1  ;;  %v23_v5 = vld [vmem:[%s598_s1] sm:$0xff]  ;;  %480 = vset.pattern.permute.xlu1 %v514_v6  ;;  %479 = vset.pattern.permute.xlu0 %v514_v6 }
   0x4   :  { %458 = vmatprep.subr.msk.mxu0 %vm68_vm0, %v53_v2  ;;  %464 = vmatprep.subr.msk.mxu1 %vm68_vm0, %v54_v3 }
   0x5   :  { %10 = vsyncpa [#allocation3], 0  ;;  %459 = vmatpush1.msk.msra.mxu0 %vm68_vm0, %v21_v0  ;;  %465 = vmatpush1.msk.msra.mxu1 %vm68_vm0, %v22_v1  ;;  %v28_v7 = vld [vmem:[%s599_s2 + $0x8] sm:$0xff]  ;;  %v30_v8 = vld [vmem:[%s599_s2 + $0x18] sm:$0xff]  ;;  %vm278_vm2 = vcmask 261120  }
   0x6   :  { %460 = vmatmul.mubr.msk.f32.vlgmr.msra.gmra.mxu0 %vm55_vm1, %v23_v5  ;;  %466 = vmatmul.mubr.msk.f32.vlgmr.msra.gmra.mxu1 %vm55_vm1, %v23_v5  ;;  %v24_v9 = vld [vmem:[%s598_s1 + $0x8] sm:$0xff]  ;;  %v27_v10 = vld [vmem:[%s599_s2] sm:$0xff]  ;;  %v29_v11 = vld [vmem:[%s599_s2 + $0x10] sm:$0xff] }
   0x7   :  { %147 = vmatprep.mubr.f32.mxu0 %v513_v4  ;;  %236 = vmatprep.mubr.f32.mxu1 %v513_v4  ;;  %v25_v12 = vld [vmem:[%s598_s1 + $0x10] sm:$0xff]  ;;  %v272_v13 = vld [vmem:[%s601_s4] sm:$0xff]  ;;  %v26_v14 = vld [vmem:[%s598_s1 + $0x18] sm:$0xff] }
   0x8   :  { %38 = vperm.xlu1 %480, %v28_v7   ;;  %48 = vperm.xlu0 %479, %v30_v8   ;;  %v271_v3 = vld [vmem:[%s600_s3] sm:$0xff]  ;;  %s515_s3 = smov [#allocation2]  }
   0x9   :  { %s450_s13 = sshll.u32 %s515_s3, 4  ;;  %s451_s13 = int_to_ptr.vmem [resolvable:$true] %s450_s13 }
   0xa   :  { %461 = vmatmul.mubr.msk.f32.gmra.mxu0 %vm55_vm1, %v24_v9  ;;  %467 = vmatmul.mubr.msk.f32.gmra.mxu1 %vm55_vm1, %v24_v9  ;;  %s491_s14 = scalar_lea.vmem %s451_s13, 512  ;;  %p496_p1 = scmp.lt.s32.totalorder %s451_s13, %s451_s13 }
   0xb   :  { %153 = vmatprep.mubr.f32.mxu0 %v513_v4  ;;  %242 = vmatprep.mubr.f32.mxu1 %v513_v4  ;;  %p492_p0 = scmp.ne.s32.totalorder %s451_s13, %s491_s14  ;;  %p497_p2 = scmp.lt.s32.totalorder %s491_s14, %s491_s14 }
   0xc   :  { %33 = vperm.xlu1 %480, %v27_v10   ;;  %43 = vperm.xlu0 %479, %v29_v11  }
   0xd   :  { %p498_p3 = por %p497_p2, %p496_p1 }
   0xe   :  { %462 = vmatmul.mubr.msk.f32.gmra.mxu0 %vm55_vm1, %v25_v12  ;;  %468 = vmatmul.mubr.msk.f32.gmra.mxu1 %vm55_vm1, %v25_v12 }
   0xf   :  { %159 = vmatprep.mubr.f32.mxu0 %v513_v4  ;;  %248 = vmatprep.mubr.f32.mxu1 %v513_v4  ;;  %p499_p4 = pnand %p498_p3, %p492_p0 }
  0x10   :  { %275 = vperm.xlu0 %479, %v272_v13  }
  0x12   :  { %463 = vmatmul.mubr.msk.f32.gmra.mxu0 %vm55_vm1, %v26_v14  ;;  %469 = vmatmul.mubr.msk.f32.gmra.mxu1 %vm55_vm1, %v26_v14 }
  0x13   :  { %346 = vmatprep.mubr.f32.mxu0 %v513_v4  ;;  %417 = vmatprep.mubr.f32.mxu1 %v513_v4 }
  0x83   :  { %v49_v23 = vpop.permute.xlu0 %48  ;;  %v39_v28 = vpop.permute.xlu1 %38 }
  0x87   :  { %v44_v31 = vpop.permute.xlu0 %43  ;;  %v34_v42 = vpop.permute.xlu1 %33 }
  0x8b   :  { %v276_v4 = vpop.permute.xlu0 %275 }
  0xc6   :  { %v143_v15 = vpop.f32.mrf.mxu0  ;;  %v232_v16 = vpop.f32.mrf.mxu1 }
  0xc7   :  { %v144_v55 = vadd.f32 %v143_v15, %v34_v42  ;;  %v233_v56 = vadd.f32 %v232_v16, %v34_v42 }
  0xc8   :  { %v145_v17 = vpop.f32.mrf.mxu0  ;;  %v234_v18 = vpop.f32.mrf.mxu1 }
  0xc9   :  { %v146_v51 = vadd.f32 %v145_v17, %v34_v42  ;;  %v235_v52 = vadd.f32 %v234_v18, %v34_v42  ;;  %v255_v1 = vmax.f32 %v144_v55, 0.0  ;;  %v257_v2 = vmax.f32 %v233_v56, 0.0 }
  0xca   :  { %v149_v19 = vpop.f32.mrf.mxu0  ;;  %v238_v20 = vpop.f32.mrf.mxu1 }
  0xcb   :  { %v150_v47 = vadd.f32 %v149_v19, %v39_v28  ;;  %v239_v48 = vadd.f32 %v238_v20, %v39_v28  ;;  %v256_v63 = vmax.f32 %v146_v51, 0.0  ;;  %v258_v0 = vmax.f32 %v235_v52, 0.0 }
  0xcc   :  { %v151_v21 = vpop.f32.mrf.mxu0  ;;  %v240_v22 = vpop.f32.mrf.mxu1 }
  0xcd   :  { %v152_v43 = vadd.f32 %v151_v21, %v39_v28  ;;  %v241_v44 = vadd.f32 %v240_v22, %v39_v28  ;;  %v259_v61 = vmax.f32 %v150_v47, 0.0  ;;  %v261_v62 = vmax.f32 %v239_v48, 0.0 }
  0xce   :  { %v155_v24 = vpop.f32.mrf.mxu0  ;;  %v244_v25 = vpop.f32.mrf.mxu1 }
  0xcf   :  { %v156_v40 = vadd.f32 %v155_v24, %v44_v31  ;;  %v245_v41 = vadd.f32 %v244_v25, %v44_v31  ;;  %v260_v59 = vmax.f32 %v152_v43, 0.0  ;;  %v262_v60 = vmax.f32 %v241_v44, 0.0 }
  0xd0   :  { %v157_v26 = vpop.f32.mrf.mxu0  ;;  %v246_v27 = vpop.f32.mrf.mxu1 }
  0xd1   :  { %v158_v36 = vadd.f32 %v157_v26, %v44_v31  ;;  %v247_v37 = vadd.f32 %v246_v27, %v44_v31  ;;  %v263_v57 = vmax.f32 %v156_v40, 0.0  ;;  %v265_v58 = vmax.f32 %v245_v41, 0.0 }
  0xd2   :  { %v161_v29 = vpop.f32.mrf.mxu0  ;;  %v250_v30 = vpop.f32.mrf.mxu1 }
  0xd3   :  { %v162_v32 = vadd.f32 %v161_v29, %v49_v23  ;;  %v251_v33 = vadd.f32 %v250_v30, %v49_v23  ;;  %v264_v53 = vmax.f32 %v158_v36, 0.0  ;;  %v266_v54 = vmax.f32 %v247_v37, 0.0 }
  0xd4   :  { %v163_v34 = vpop.f32.mrf.mxu0  ;;  %v252_v35 = vpop.f32.mrf.mxu1 }
  0xd5   :  { %v164_v38 = vadd.f32 %v163_v34, %v49_v23  ;;  %v253_v39 = vadd.f32 %v252_v35, %v49_v23  ;;  %v267_v49 = vmax.f32 %v162_v32, 0.0  ;;  %v269_v50 = vmax.f32 %v251_v33, 0.0 }
  0xd7   :  { %v268_v45 = vmax.f32 %v164_v38, 0.0  ;;  %v270_v46 = vmax.f32 %v253_v39, 0.0 }
  0xd9   :  { %306 = vmatprep.subr.mxu0 %v268_v45  ;;  %377 = vmatprep.subr.mxu1 %v270_v46 }
  0xda   :  { %307 = vmatpush1.msra.mxu0 %v267_v49  ;;  %378 = vmatpush1.msra.mxu1 %v269_v50 }
  0xdb   :  { %308 = vmatprep.subr.mxu0 %v264_v53  ;;  %379 = vmatprep.subr.mxu1 %v266_v54 }
  0xdc   :  { %309 = vmatpush1.msra.mxu0 %v263_v57  ;;  %380 = vmatpush1.msra.mxu1 %v265_v58 }
  0xdd   :  { %310 = vmatprep.subr.mxu0 %v260_v59  ;;  %381 = vmatprep.subr.mxu1 %v262_v60 }
  0xde   :  { %311 = vmatpush1.msra.mxu0 %v259_v61  ;;  %382 = vmatpush1.msra.mxu1 %v261_v62 }
  0xdf   :  { %312 = vmatprep.subr.mxu0 %v256_v63  ;;  %383 = vmatprep.subr.mxu1 %v258_v0 }
  0xe0   :  { %313 = vmatpush1.msra.mxu0 %v255_v1  ;;  %384 = vmatpush1.msra.mxu1 %v257_v2 }
  0xe1   :  { %470 = vmatmul.mubr.msk.f32.vlgmr.msra.gmra.mxu0 %vm278_vm2, %v271_v3  ;;  %471 = vmatmul.mubr.msk.f32.vlgmr.msra.gmra.mxu1 %vm278_vm2, %v271_v3 }
 0x1a1   :  { %v348_v5 = vpop.f32.mrf.mxu0  ;;  %v419_v6 = vpop.f32.mrf.mxu1 }
 0x1a2   :  { %v349_v7 = vadd.f32 %v348_v5, %v276_v4  ;;  %v420_v8 = vadd.f32 %v419_v6, %v276_v4 }
 0x1a3   :  { %v350_v9 = vpop.f32.mrf.mxu0  ;;  %v421_v10 = vpop.f32.mrf.mxu1 }
 0x1a4   :  { %v472_v11 = vclamps-f32 %v349_v7, 6.9077554  ;;  %v474_v12 = vclamps-f32 %v420_v8, 6.9077554  ;;  %v351_v13 = vadd.f32 %v350_v9, %v276_v4  ;;  %v422_v14 = vadd.f32 %v421_v10, %v276_v4 }
 0x1a6   :  { %v432_v15 = vmul.f32 1.442695, %v472_v11  ;;  %v436_v16 = vmul.f32 1.442695, %v474_v12  ;;  %v473_v17 = vclamps-f32 %v351_v13, 6.9077554 }
 0x1a7   :  { %v475_v18 = vclamps-f32 %v422_v14, 6.9077554 }
 0x1a8   :  { %483 = vpow2.f32 %v432_v15  ;;  %v434_v19 = vmul.f32 1.442695, %v473_v17 }
 0x1a9   :  { %485 = vpow2.f32 %v436_v16  ;;  %v438_v20 = vmul.f32 1.442695, %v475_v18 }
 0x1aa   :  { %487 = vpow2.f32 %v434_v19 }
 0x1ab   :  { %489 = vpow2.f32 %v438_v20 }
 0x1b5   :  { %v484_v21 = vpop.eup %483 }
 0x1b6   :  { %v486_v22 = vpop.eup %485  ;;  %440 = vst [vmem:[#allocation2] sm:$0xff] %v484_v21 }
 0x1b7   :  { %v488_v23 = vpop.eup %487  ;;  %442 = vst [vmem:[#allocation2 + $0x10] sm:$0xff] %v486_v22 }
 0x1b8   :  { %v490_v24 = vpop.eup %489  ;;  %441 = vst [vmem:[#allocation2 + $0x8] sm:$0xff] %v488_v23 }
 0x1b9   :  { %443 = vst [vmem:[#allocation2 + $0x18] sm:$0xff] %v490_v24 }
 0x1ba   :  { %502 = shalt.err (!%p499_p4)
}
 0x1bb   :  { %453 = dma.vmem_to_hbm [thread:$0]  %s451_s13, 512, %s602_s5, [#allocation3]  }
 0x1bc   :  { %511 = dma.done.wait [#allocation3], 512  }
 0x1bd   :  { %512 = vsyncadd [#allocation3], 4294966784 }
 0x1be   :  { %457 = vsyncpa [#allocation3], 1 }

</bundles_post_ra>
